<compile_context>
chip_gen: v7x
topology: tpu7x:2x2x1
jax: 0.10.0
libtpu: 0.0.40
codegen_flags: <defaults>
</compile_context>

<pallas_src>
import jax
import jax.numpy as jnp
from jax.experimental import pallas as pl
from jax.experimental.pallas import tpu as pltpu

EPS = 1e-6  # guards fp underflow in the z-plus denominator (softmax > 0 otherwise)


def _irefxg_softmax_kernel(x_ref, rel_ref, ref_ref, y_ref, attr_ref):
    x = x_ref[...].astype(jnp.float32)
    rel = rel_ref[...].astype(jnp.float32)
    r = ref_ref[...].astype(jnp.float32)

    # Numerically-stable softmax over the last (lane) dimension.
    # Exact reciprocal here: the forward output is checked at 1e-5 tolerance.
    m = jnp.max(x, axis=-1, keepdims=True)
    e = jnp.exp(x - m)
    y = e * pl.reciprocal(jnp.sum(e, axis=-1, keepdims=True), approx=False)
    y_ref[...] = y.astype(y_ref.dtype)

    # z-plus modifier: relu(y) == y because softmax output is strictly positive,
    # so the redundant clamp is dropped.  The attribution-path reciprocal goes
    # to the EUP slot (approx=True) instead of adding VALU work.
    s = rel * pl.reciprocal(y + EPS, approx=True)
    # Softmax Jacobian-transpose-vector product: J^T s = y * (s - <y, s>).
    proj = jnp.sum(y * s, axis=-1, keepdims=True)
    g = y * (s - proj)
    attr_ref[...] = ((x - r) * g).astype(attr_ref.dtype)


def _choose_row_tile(rows, d, itemsize):
    """Largest sublane-aligned row tile that keeps the working set in budget."""
    # Sublane packing: 8 rows/vreg for 4-byte dtypes, 16 for bf16/fp16.
    align = 8 if itemsize >= 4 else 16
    # Per grid step: 5 streams (3 in + 2 out), double-buffered, plus ~6 f32
    # temporaries per row inside the body.  A 32 MiB data budget stays safely
    # under the 48 MiB scoped limit on every generation (v7x: 64 MiB physical).
    budget = 32 * 1024 * 1024
    per_row = (2 * 5 * itemsize + 6 * 4) * d
    tile = min(budget // per_row, 1024)            # diminishing returns past ~1024 rows
    # Keep >= ~8 grid steps when possible: lets the "parallel" axis shard across
    # both v7x TensorCores and keeps the DMA pipeline busy.
    tile = min(tile, max(align, rows // 8))
    return max(align, (tile // align) * align)


@jax.jit
def irefxg_softmax_zplus(x, relevance, reference):
    """x, relevance, reference: [B, S, D]. Returns (softmax(x), attribution)."""
    B, S, D = x.shape
    rows = B * S
    assert D % 128 == 0, "softmax dim must be lane-aligned (multiple of 128)"

    tile = _choose_row_tile(rows, D, x.dtype.itemsize)
    grid_rows = pl.cdiv(rows, tile) * tile

    x2 = x.reshape(rows, D)
    rel2 = relevance.reshape(rows, D)
    ref2 = reference.reshape(rows, D)
    if grid_rows != rows:
        # Tail rows: pad with zeros (softmax of zeros is uniform, relevance 0
        # gives zero attribution) and slice the results back afterwards.
        pad = ((0, grid_rows - rows), (0, 0))
        x2, rel2, ref2 = (jnp.pad(a, pad) for a in (x2, rel2, ref2))

    spec = pl.BlockSpec((tile, D), lambda i: (i, 0))

    y2, attr2 = pl.pallas_call(
        _irefxg_softmax_kernel,
        out_shape=(
            jax.ShapeDtypeStruct((grid_rows, D), x.dtype),
            jax.ShapeDtypeStruct((grid_rows, D), x.dtype),
        ),
        grid_spec=pltpu.PrefetchScalarGridSpec(
            num_scalar_prefetch=0,
            grid=(grid_rows // tile,),
            in_specs=[spec, spec, spec],
            out_specs=[spec, spec],
        ),
        compiler_params=pltpu.CompilerParams(
            dimension_semantics=("parallel",),
            # Above the 32 MiB scoped default, below v7x's 64 MiB physical VMEM.
            vmem_limit_bytes=48 * 1024 * 1024,
        ),
    )(x2, rel2, ref2)

    return y2[:rows].reshape(B, S, D), attr2[:rows].reshape(B, S, D)


def _ref_impl(x, relevance, reference):
    """Pure-JAX reference for correctness checking."""
    y = jax.nn.softmax(x.astype(jnp.float32), axis=-1)
    s = relevance.astype(jnp.float32) / (jax.nn.relu(y) + EPS)
    g = y * (s - jnp.sum(y * s, axis=-1, keepdims=True))
    attr = (x.astype(jnp.float32) - reference.astype(jnp.float32)) * g
    return y.astype(x.dtype), attr.astype(x.dtype)


if __name__ == "__main__":
    key = jax.random.PRNGKey(0)
    k1, k2 = jax.random.split(key)

    B, S, D = 4, 64, 128  # small demo; D last = softmax dim = TPU lanes
    x = jax.random.normal(k1, (B, S, D), dtype=jnp.float32)
    relevance = jax.random.normal(k2, (B, S, D), dtype=jnp.float32)
    # ref_fn: zero baseline (deterministic, in-script).
    reference = jnp.zeros_like(x)

    y, attr = irefxg_softmax_zplus(x, relevance, reference)
    jax.block_until_ready((y, attr))

    y_ref, attr_ref = _ref_impl(x, relevance, reference)
    assert jnp.allclose(y, y_ref, atol=1e-5, rtol=1e-5)

    # The attribution path uses the EUP approximate reciprocal, so compare with
    # a norm-based relative error (robust to per-element cancellation).
    num = jnp.linalg.norm(attr.astype(jnp.float32) - attr_ref.astype(jnp.float32))
    den = jnp.linalg.norm(attr_ref.astype(jnp.float32)) + 1e-12
    assert float(num / den) < 1e-2, float(num / den)

    print("KERNEL_OK")
</pallas_src>

<mosaic_0001>
module attributes {stable_mosaic.version = 11 : i64} {
  func.func @_irefxg_softmax_kernel(%arg0: i32, %arg1: memref<32x128xf32, #tpu.memory_space<vmem>>, %arg2: memref<32x128xf32, #tpu.memory_space<vmem>>, %arg3: memref<32x128xf32, #tpu.memory_space<vmem>>, %arg4: memref<32x128xf32, #tpu.memory_space<vmem>>, %arg5: memref<32x128xf32, #tpu.memory_space<vmem>>) attributes {dimension_semantics = [#tpu.dimension_semantics<parallel>], iteration_bounds = array<i64: 8>, scalar_prefetch = 0 : i64, scratch_operands = 0 : i64, tpu.core_type = #tpu.core_type<tc>, window_params = [{transform_indices = @transform_0, window_bounds = array<i64: 32, 128>}, {transform_indices = @transform_1, window_bounds = array<i64: 32, 128>}, {transform_indices = @transform_2, window_bounds = array<i64: 32, 128>}, {transform_indices = @transform_3, window_bounds = array<i64: 32, 128>}, {transform_indices = @transform_4, window_bounds = array<i64: 32, 128>}]} {
    %c0 = arith.constant 0 : index
    %c0_0 = arith.constant 0 : index
    %0 = vector.load %arg1[%c0, %c0_0] : memref<32x128xf32, #tpu.memory_space<vmem>>, vector<32x128xf32>
    %c0_1 = arith.constant 0 : index
    %c0_2 = arith.constant 0 : index
    %1 = vector.load %arg2[%c0_1, %c0_2] : memref<32x128xf32, #tpu.memory_space<vmem>>, vector<32x128xf32>
    %c0_3 = arith.constant 0 : index
    %c0_4 = arith.constant 0 : index
    %2 = vector.load %arg3[%c0_3, %c0_4] : memref<32x128xf32, #tpu.memory_space<vmem>>, vector<32x128xf32>
    %cst = arith.constant dense<0xFF800000> : vector<32xf32>
    %3 = vector.multi_reduction <maximumf>, %0, %cst [1] : vector<32x128xf32> to vector<32xf32>
    %4 = vector.shape_cast %3 : vector<32xf32> to vector<32x1xf32>
    %5 = vector.broadcast %4 : vector<32x1xf32> to vector<32x128xf32>
    %6 = arith.subf %0, %5 : vector<32x128xf32>
    %7 = math.exp %6 : vector<32x128xf32>
    %cst_5 = arith.constant dense<0.000000e+00> : vector<32xf32>
    %8 = vector.multi_reduction <add>, %7, %cst_5 [1] : vector<32x128xf32> to vector<32xf32>
    %9 = vector.shape_cast %8 : vector<32xf32> to vector<32x1xf32>
    %10 = tpu.reciprocal %9 : vector<32x1xf32> -> vector<32x1xf32>
    %11 = vector.broadcast %10 : vector<32x1xf32> to vector<32x128xf32>
    %12 = arith.mulf %7, %11 : vector<32x128xf32>
    %c0_6 = arith.constant 0 : index
    %c0_7 = arith.constant 0 : index
    %13 = vector.load %arg4[%c0_6, %c0_7] : memref<32x128xf32, #tpu.memory_space<vmem>>, vector<32x128xf32>
    tpu.vector_store %arg4[%c0_6, %c0_7], %12 {strides = array<i32>} : memref<32x128xf32, #tpu.memory_space<vmem>>, vector<32x128xf32>,
    %cst_8 = arith.constant 9.99999997E-7 : f32
    %14 = vector.broadcast %cst_8 : f32 to vector<32x128xf32>
    %15 = arith.addf %12, %14 : vector<32x128xf32>
    %16 = tpu.reciprocal %15 {approx = true} : vector<32x128xf32> -> vector<32x128xf32>
    %17 = arith.mulf %1, %16 : vector<32x128xf32>
    %18 = arith.mulf %12, %17 : vector<32x128xf32>
    %cst_9 = arith.constant dense<0.000000e+00> : vector<32xf32>
    %19 = vector.multi_reduction <add>, %18, %cst_9 [1] : vector<32x128xf32> to vector<32xf32>
    %20 = vector.shape_cast %19 : vector<32xf32> to vector<32x1xf32>
    %21 = vector.broadcast %20 : vector<32x1xf32> to vector<32x128xf32>
    %22 = arith.subf %17, %21 : vector<32x128xf32>
    %23 = arith.mulf %12, %22 : vector<32x128xf32>
    %24 = arith.subf %0, %2 : vector<32x128xf32>
    %25 = arith.mulf %24, %23 : vector<32x128xf32>
    %c0_10 = arith.constant 0 : index
    %c0_11 = arith.constant 0 : index
    %26 = vector.load %arg5[%c0_10, %c0_11] : memref<32x128xf32, #tpu.memory_space<vmem>>, vector<32x128xf32>
    tpu.vector_store %arg5[%c0_10, %c0_11], %25 {strides = array<i32>} : memref<32x128xf32, #tpu.memory_space<vmem>>, vector<32x128xf32>,
    return
  }
  func.func @transform_0(%arg0: i32) -> (i32, i32) {
    %c0_i32 = arith.constant 0 : i32
    %c0_i32_0 = arith.constant 0 : i32
    return %arg0, %c0_i32 : i32, i32
  }
  func.func @transform_1(%arg0: i32) -> (i32, i32) {
    %c0_i32 = arith.constant 0 : i32
    %c0_i32_0 = arith.constant 0 : i32
    return %arg0, %c0_i32 : i32, i32
  }
  func.func @transform_2(%arg0: i32) -> (i32, i32) {
    %c0_i32 = arith.constant 0 : i32
    %c0_i32_0 = arith.constant 0 : i32
    return %arg0, %c0_i32 : i32, i32
  }
  func.func @transform_3(%arg0: i32) -> (i32, i32) {
    %c0_i32 = arith.constant 0 : i32
    %c0_i32_0 = arith.constant 0 : i32
    return %arg0, %c0_i32 : i32, i32
  }
  func.func @transform_4(%arg0: i32) -> (i32, i32) {
    %c0_i32 = arith.constant 0 : i32
    %c0_i32_0 = arith.constant 0 : i32
    return %arg0, %c0_i32 : i32, i32
  }
}

</mosaic_0001>

<bundles_post_ra>
// kernel: irefxg_softmax_zplus.1
= control target key start
LH: loop header
LB: loop body
LE: loop exit
PB: predicated region body
PF: predicated region fallthrough
CT: control target
= control target key end

     0   :  { %s1306_s0 = inlined_call_operand.hbm [shape: f32[256,128], index: 0, kind: input, shape index: {}]   ;;  %s1307_s1 = inlined_call_operand.hbm [shape: f32[256,128], index: 1, kind: input, shape index: {}]   ;;  %s1308_s2 = inlined_call_operand.hbm [shape: f32[256,128], index: 2, kind: input, shape index: {}]   ;;  %s1309_s3 = inlined_call_operand.hbm [shape: f32[256,128], index: 3, kind: output, shape index: {0}]   ;;  %s1310_s4 = inlined_call_operand.hbm [shape: f32[256,128], index: 4, kind: output, shape index: {1}]  }
   0x1   :  { %1317 = sst [smem:[#allocation15_spill]] %s1306_s0 }
   0x2   :  { %1318 = sst [smem:[#allocation16_spill]] %s1307_s1 }
   0x3   :  { %10 = vsyncpa [#allocation3], 0 }
   0x4   :  { %12 = vsyncpa [#allocation3 + $0x1], 0 }
   0x5   :  { %13 = vsyncpa [#allocation6], 0 }
   0x6   :  { %15 = vsyncpa [#allocation6 + $0x1], 0 }
   0x7   :  { %16 = vsyncpa [#allocation4], 0 }
   0x8   :  { %18 = vsyncpa [#allocation4 + $0x1], 0 }
   0x9   :  { %19 = vsyncpa [#allocation10], 0 }
   0xa   :  { %21 = vsyncpa [#allocation10 + $0x1], 0  ;;  %s936_s15 = smov 0   ;;  %s938_s16 = smov 0  }
   0xb   :  { %s940_s17 = smov 0   ;;  %s942_s18 = smov 0  }
   0xc LB: > { %s957_s19 = sadd.s32 4294967295, %s900_s18   ;;  %s588_s20 = sadd.s32 4294967294, %s900_s18   ;;  %s900_s18 = sphi %s942_s18, %s1337_s18   ;;  %s896_s17 = sphi %s940_s17, %s1336_s17   ;;  %s892_s16 = sphi %s938_s16, %s1335_s16   ;;  %s888_s15 = sphi %s936_s15, %s1334_s15  }
   0xd   : > { %s961_s21 = sadd.s32 1, %s900_s18   ;;  %s34_s22 = sadd.s32 1, %s896_s17 }
   0xe   : > { %s31_s23 = ssub.s32 %s900_s18, %s961_s21  ;;  %p41_p0 = scmp.ne.s32.totalorder %s896_s17, %s892_s16 }
   0xf   : > { %p32_p1 = scmp.eq.s32.totalorder %s31_s23, 0  ;;  %p42_p2 = scmp.eq.s32.totalorder %s900_s18, 0 }
  0x10   : > { %p47_p3 = scmp.ne.s32.totalorder %s892_s16, %s888_s15  ;;  %p48_p4 = scmp.eq.s32.totalorder %s957_s19, 0 }
  0x11   : > { %s973_s24 = scalar_select %p32_p1, %s896_s17, %s34_s22  }
  0x12   : > { %p43_p5 = por %p42_p2, %p41_p0  ;;  %p975_p6 = por %p48_p4, %p47_p3 }
  0x13   : > { %p123_p7 = scmp.eq.s32.totalorder %s957_s19, 7  ;;  %p129_p8 = scmp.eq.s32.totalorder %s588_s20, 7 }
  0x14   : > { %s1319_s25 = scalar_select %p975_p6, 1, 0 }
  0x15   : > { %p646_p9 = scmp.lt.s32.totalorder %s900_s18, 8  ;;  %p981_p10 = por %p123_p7, %p41_p0 }
  0x16   : > { %p985_p11 = por %p129_p8, %p47_p3  ;;  %s175_s28 = sand.u32 1, %s896_s17  }
  0x17   : > { %s1320_s26 = scalar_select %p981_p10, 1, 0 }
  0x18   : > { %s1321_s27 = scalar_select %p985_p11, 1, 0 }
  0x19   : > { %s991_s29 = sshll.u32 %s900_s18, 9  ;;  %s995_s30 = sshll.u32 %s175_s28, 5 }
  0x1a   : > { %p997_p12 = pnand %p646_p9, %p43_p5  ;;  %s196_s6 = sand.u32 1, %s900_s18  }
  0x1b   : > { %s1323_s1 = sld [smem:[#allocation16_spill]]  ;;  %s200_s10 = scalar_lea.vmem [#allocation5], %s995_s30 }
  0x1c   : > { %s207_s11 = sshll.u32 %s200_s10, 4  ;;  %s1012_s12 = scalar_lea.sflag [#allocation6], %s196_s6  ;;  %s1009_s11 = int_to_ptr.vmem [resolvable:$true] %s207_s11 }
  0x1d   : > { %p1018_p1 = pneg %p997_p12 }
  0x21   : > { %s1006_s9 = scalar_lea.hbm %s1323_s1, %s991_s29  ;;  %s713_s23 = scalar_lea.hbm %s1323_s1, 4096 }
  0x22   : > { %s708_s13 = scalar_lea.hbm %s1006_s9, 512  ;;  %p714_p4 = scmp.lt.u32.totalorder %s1006_s9, %s1323_s1 }
  0x23   : > { %p709_p0 = scmp.ne.s32.totalorder %s1006_s9, %s708_s13  ;;  %p715_p5 = scmp.lt.u32.totalorder %s713_s23, %s708_s13 }
  0x24   : > { %p717_p8 = scmp.lt.u32.totalorder %s708_s13, %s1006_s9 }
  0x25   : > { %p711_p2 = pnand %p1018_p1, %p709_p0  ;;  %p716_p7 = por %p715_p5, %p714_p4 }
  0x27   : > { %p712_p3 = pneg %p711_p2  ;;  %p718_p9 = por %p717_p8, %p716_p7 }
  0x29   : > { %p719_p13 = pnand %p718_p9, %p712_p3 }
  0x2b   : > { %722 = shalt.err (!%p719_p13)
}
  0x2c   : > { %s723_s6 = scalar_lea.vmem %s1009_s11, 512  ;;  %s902_s10 = smov [#allocation5]  }
  0x2d   : > { %p724_p0 = scmp.ne.s32.totalorder %s1009_s11, %s723_s6  ;;  %s728_s20 = sshll.u32 %s902_s10, 4  ;;  %s729_s20 = int_to_ptr.vmem [resolvable:$false] %s728_s20 }
  0x2e   : > { %s730_s22 = scalar_lea.vmem %s729_s20, 1024  ;;  %p731_p10 = scmp.lt.s32.totalorder %s1009_s11, %s729_s20 }
  0x2f   : > { %p726_p2 = pnand %p724_p0, %p1018_p1  ;;  %p732_p6 = scmp.lt.s32.totalorder %s730_s22, %s723_s6 }
  0x31   : > { %p727_p11 = pneg %p726_p2  ;;  %p733_p4 = por %p732_p6, %p731_p10 }
  0x33   : > { %p734_p5 = pnand %p733_p4, %p727_p11 }
  0x35   : > { %737 = shalt.err (!%p734_p5)
}
  0x36   : > { %s1313_s13 = smov 128   ;;  %s1315_s23 = smov 8  }
  0x37   : > { %635 = dma.hbm_to_vmem [thread:$0]  (!%p997_p12), %s1006_s9, 512, %s1009_s11, %s1012_s12, %s1313_s13, %s1313_s13, %s1315_s23  }
  0x38   : > { %p236_p6 = scmp.lt.s32.totalorder %s900_s18, 9  ;;  %s1325_s0 = sld [smem:[#allocation15_spill]] }
  0x39   : > { %p1326_p10 = scmp.ge.s32.totalorder %s900_s18, 1  ;;  %s179_s20 = scalar_lea.vmem [#allocation2], %s995_s30 }
  0x3a   : > { %s186_s22 = sshll.u32 %s179_s20, 4  ;;  %s1063_s9 = scalar_lea.sflag [#allocation3], %s175_s28  ;;  %s1059_s22 = int_to_ptr.vmem [resolvable:$true] %s186_s22 }
  0x3b   : > { %p1054_p11 = pnand %p1326_p10, %p236_p6 }
  0x3d   : > { %s1327_s10 = scalar_select %p1054_p11, 1, 0 }
  0x3e   : > { %s1050_s6 = scalar_lea.hbm %s1325_s0, %s991_s29  ;;  %s743_s13 = scalar_lea.hbm %s1325_s0, 4096 }
  0x3f   : > { %s738_s11 = scalar_lea.hbm %s1050_s6, 512  ;;  %p744_p8 = scmp.lt.u32.totalorder %s1050_s6, %s1325_s0 }
  0x40   : > { %p739_p13 = scmp.ne.s32.totalorder %s1050_s6, %s738_s11  ;;  %p745_p9 = scmp.lt.u32.totalorder %s743_s13, %s738_s11 }
  0x41   : > { %p747_p2 = scmp.lt.u32.totalorder %s738_s11, %s1050_s6 }
  0x42   : > { %p741_p3 = pnand %p739_p13, %p1018_p1  ;;  %p746_p0 = por %p745_p9, %p744_p8 }
  0x44   : > { %p742_p7 = pneg %p741_p3  ;;  %p748_p4 = por %p747_p2, %p746_p0 }
  0x46   : > { %p749_p5 = pnand %p748_p4, %p742_p7 }
  0x48   : > { %752 = shalt.err (!%p749_p5)
}
  0x49   : > { %s753_s28 = scalar_lea.vmem %s1059_s22, 512  ;;  %s905_s20 = smov [#allocation2]  }
  0x4a   : > { %p754_p6 = scmp.ne.s32.totalorder %s1059_s22, %s753_s28  ;;  %s758_s7 = sshll.u32 %s905_s20, 4  ;;  %s759_s7 = int_to_ptr.vmem [resolvable:$false] %s758_s7 }
  0x4b   : > { %s760_s1 = scalar_lea.vmem %s759_s7, 1024  ;;  %p761_p3 = scmp.lt.s32.totalorder %s1059_s22, %s759_s7 }
  0x4c   : > { %p756_p10 = pnand %p754_p6, %p1018_p1  ;;  %p762_p11 = scmp.lt.s32.totalorder %s760_s1, %s753_s28 }
  0x4e   : > { %p757_p13 = pneg %p756_p10  ;;  %p763_p8 = por %p762_p11, %p761_p3 }
  0x50   : > { %p764_p9 = pnand %p763_p8, %p757_p13 }
  0x52   : > { %767 = shalt.err (!%p764_p9)
}
  0x53   : > { %s1328_s13 = smov 8   ;;  %s1329_s23 = smov 128  }
  0x54   : > { %632 = dma.hbm_to_vmem [thread:$0]  (!%p997_p12), %s1050_s6, 512, %s1059_s22, %s1063_s9, %s1329_s23, %s1329_s23, %s1328_s13  }
  0x55   : > { %s1094_s20 = scalar_lea.hbm %s1308_s2, %s991_s29  ;;  %s221_s28 = scalar_lea.vmem [#allocation7], %s995_s30 }
  0x56   : > { %s228_s7 = sshll.u32 %s221_s28, 4  ;;  %s768_s1 = scalar_lea.hbm %s1094_s20, 512  ;;  %s1097_s7 = int_to_ptr.vmem [resolvable:$true] %s228_s7 }
  0x57   : > { %p769_p11 = scmp.ne.s32.totalorder %s1094_s20, %s768_s1  ;;  %s773_s22 = scalar_lea.hbm %s1308_s2, 4096 }
  0x58   : > { %p774_p2 = scmp.lt.u32.totalorder %s1094_s20, %s1308_s2  ;;  %p775_p4 = scmp.lt.u32.totalorder %s773_s22, %s768_s1 }
  0x59   : > { %p771_p7 = pnand %p769_p11, %p1018_p1  ;;  %p777_p6 = scmp.lt.u32.totalorder %s768_s1, %s1094_s20 }
  0x5a   : > { %p776_p5 = por %p775_p4, %p774_p2 }
  0x5b   : > { %p772_p0 = pneg %p771_p7 }
  0x5c   : > { %p778_p10 = por %p777_p6, %p776_p5 }
  0x5e   : > { %p779_p13 = pnand %p778_p10, %p772_p0 }
  0x60   : > { %782 = shalt.err (!%p779_p13)
}
  0x61   : > { %s783_s30 = scalar_lea.vmem %s1097_s7, 512  ;;  %s906_s0 = smov [#allocation7]  }
  0x62   : > { %p784_p3 = scmp.ne.s32.totalorder %s1097_s7, %s783_s30  ;;  %s788_s11 = sshll.u32 %s906_s0, 4  ;;  %s789_s11 = int_to_ptr.vmem [resolvable:$false] %s788_s11 }
  0x63   : > { %s790_s8 = scalar_lea.vmem %s789_s11, 1024  ;;  %p791_p11 = scmp.lt.s32.totalorder %s1097_s7, %s789_s11 }
  0x64   : > { %p786_p8 = pnand %p784_p3, %p1018_p1  ;;  %p792_p7 = scmp.lt.s32.totalorder %s790_s8, %s783_s30 }
  0x66   : > { %p787_p9 = pneg %p786_p8  ;;  %p793_p2 = por %p792_p7, %p791_p11 }
  0x68   : > { %p794_p4 = pnand %p793_p2, %p787_p9 }
  0x6a   : > { %797 = shalt.err (!%p794_p4)
}
  0x6b   : > { %638 = dma.hbm_to_vmem [thread:$0]  (!%p997_p12), %s1094_s20, 512, %s1097_s7, %s1012_s12, %s1329_s23, %s1329_s23, %s1328_s13  }
  0x6c   : > { %p1330_p1 = scmp.ne.s32.totalorder %s1327_s10, 0 }
  0x6d   : > { %s1127_s14 = sand.u32 (!%p1330_p1), 1, %s892_s16   ;;  %p1331_p0 = scmp.ne.s32.totalorder (!%p1330_p1), %s1319_s25, 0 }
  0x6e   : > { %240 = sbr.rel (%p1330_p1) target bundleno = 621 (0x26d), region = 32  ;;  %s1130_s28 = sshll.u32 (!%p1330_p1), %s1127_s14, 5 }
  0x6f   : > { %s243_s5 = scalar_lea.sflag (!%p1330_p1), [#allocation3], %s1127_s14  ;;  %s246_s1 = scalar_lea.vmem (!%p1330_p1), [#allocation2], %s1130_s28 }
  0x75   : > { %871 = dma.done.wait (%p1331_p0), %s243_s5, 512  }
  0x76   : > { %873 = vsyncadd (%p1331_p0), %s243_s5, 4294966784  ;;  %s251_s12 = sand.u32 1, %s957_s19   ;;  %s1140_s13 = scalar_lea.vmem [#allocation5], %s1130_s28 }
  0x77   : > { %s252_s10 = scalar_lea.sflag [#allocation6], %s251_s12 }
  0x78   : > { %875 = dma.done.wait (%p1331_p0), %s252_s10, 1024  }
  0x79   : > { %877 = vsyncadd (%p1331_p0), %s252_s10, 4294966272  ;;  %v1146_v0 = vld [vmem:[%s246_s1] sm:$0xff]  ;;  %v1148_v1 = vld [vmem:[%s246_s1 + $0x10] sm:$0xff]  ;;  %s1166_s25 = scalar_lea.vmem [#allocation8], %s1130_s28  ;;  %s617_s23 = sshll.u32 %s957_s19, 9 }
  0x7a   : > { %321 = vmax.xlane.f32.xlu0 %v1146_v0  ;;  %325 = vmax.xlane.f32.xlu1 %v1148_v1  ;;  %v1152_v2 = vld [vmem:[%s246_s1 + $0x8] sm:$0xff]  ;;  %v1154_v3 = vld [vmem:[%s246_s1 + $0x18] sm:$0xff]  ;;  %v313_v36 = vld [vmem:[%s1140_s13] sm:$0xff]  ;;  %s1208_s6 = scalar_lea.hbm %s1309_s3, %s617_s23  ;;  %s424_s22 = sshll.u32 %s1166_s25, 4  ;;  %s1211_s22 = int_to_ptr.vmem [resolvable:$true] %s424_s22 }
  0x7b   : > { %v314_v39 = vld [vmem:[%s1140_s13 + $0x8] sm:$0xff]  ;;  %v315_v41 = vld [vmem:[%s1140_s13 + $0x10] sm:$0xff]  ;;  %v316_v46 = vld [vmem:[%s1140_s13 + $0x18] sm:$0xff]  ;;  %s406_s9 = scalar_lea.sflag [#allocation4], %s1127_s14  ;;  %s798_s29 = scalar_lea.vmem %s1211_s22, 512 }
  0x7c   : > { %p799_p12 = scmp.ne.s32.totalorder %s1211_s22, %s798_s29  ;;  %p1332_p5 = scmp.ne.s32.totalorder %s1320_s26, 0 }
  0x7d   : > { %s907_s30 = smov [#allocation8]  }
  0x7e   : > { %323 = vmax.xlane.f32.xlu0 %v1152_v2  ;;  %327 = vmax.xlane.f32.xlu1 %v1154_v3  ;;  %p800_p6 = pnand %p799_p12, %p1332_p5  ;;  %s802_s0 = sshll.u32 %s907_s30, 4  ;;  %s803_s0 = int_to_ptr.vmem [resolvable:$false] %s802_s0 }
  0x7f   : > { %s804_s11 = scalar_lea.vmem %s803_s0, 1024  ;;  %p805_p13 = scmp.lt.s32.totalorder %s1211_s22, %s803_s0 }
  0x80   : > { %p801_p10 = pneg %p800_p6  ;;  %p806_p3 = scmp.lt.s32.totalorder %s804_s11, %s798_s29 }
  0x82   : > { %p807_p8 = por %p806_p3, %p805_p13 }
  0x84   : > { %p808_p9 = pnand %p807_p8, %p801_p10 }
 0x107   : > { %v322_v4 = vpop.xlane.xlu0 %321  ;;  %v326_v5 = vpop.xlane.xlu1 %325 }
 0x108   : > { %v329_v6 = vsub.f32 %v1146_v0, %v322_v4  ;;  %v331_v7 = vsub.f32 %v1148_v1, %v326_v5 }
 0x10a   : > { %v333_v8 = vmul.f32 1.442695, %v329_v6  ;;  %v337_v9 = vmul.f32 1.442695, %v331_v7 }
 0x10b   : > { %v324_v10 = vpop.xlane.xlu0 %323  ;;  %v328_v11 = vpop.xlane.xlu1 %327 }
 0x10c   : > { %684 = vpow2.f32 %v333_v8  ;;  %v330_v12 = vsub.f32 %v1152_v2, %v324_v10  ;;  %v332_v13 = vsub.f32 %v1154_v3, %v328_v11 }
 0x10d   : > { %686 = vpow2.f32 %v337_v9 }
 0x10e   : > { %v335_v14 = vmul.f32 1.442695, %v330_v12  ;;  %v339_v15 = vmul.f32 1.442695, %v332_v13 }
 0x110   : > { %688 = vpow2.f32 %v335_v14 }
 0x111   : > { %690 = vpow2.f32 %v339_v15 }
 0x116   : > { %v685_v16 = vpop.eup %684 }
 0x117   : > { %341 = vadd.xlane.f32.xlu0 %v685_v16  ;;  %v687_v17 = vpop.eup %686 }
 0x11a   : > { %v689_v18 = vpop.eup %688 }
 0x11b   : > { %345 = vadd.xlane.f32.xlu0 %v687_v17  ;;  %343 = vadd.xlane.f32.xlu1 %v689_v18  ;;  %v691_v19 = vpop.eup %690 }
 0x11f   : > { %347 = vadd.xlane.f32.xlu1 %v691_v19 }
 0x1a4   : > { %v342_v20 = vpop.xlane.xlu0 %341 }
 0x1a5   : > { %692 = vrcp.f32 %v342_v20 }
 0x1a8   : > { %v344_v21 = vpop.xlane.xlu1 %343  ;;  %v346_v22 = vpop.xlane.xlu0 %345 }
 0x1a9   : > { %694 = vrcp.f32 %v344_v21 }
 0x1aa   : > { %696 = vrcp.f32 %v346_v22 }
 0x1ac   : > { %v348_v23 = vpop.xlane.xlu1 %347 }
 0x1ad   : > { %698 = vrcp.f32 %v348_v23 }
 0x1af   : > { %v693_v24 = vpop.eup %692 }
 0x1b0   : > { %v1162_v25 = vmul.f32 %v693_v24, %v685_v16 }
 0x1b2   : > { %v361_v26 = vadd.f32 1e-06, %v1162_v25  ;;  %357 = vst [vmem:[%s1166_s25] sm:$0xff] %v1162_v25 }
 0x1b3   : > { %v695_v27 = vpop.eup %694 }
 0x1b4   : > { %v697_v28 = vpop.eup %696  ;;  %700 = vrcp.f32 %v361_v26  ;;  %v1170_v29 = vmul.f32 %v695_v27, %v689_v18 }
 0x1b5   : > { %v1172_v30 = vmul.f32 %v697_v28, %v687_v17 }
 0x1b6   : > { %v362_v31 = vadd.f32 1e-06, %v1170_v29  ;;  %358 = vst [vmem:[%s1166_s25 + $0x8] sm:$0xff] %v1170_v29 }
 0x1b7   : > { %v699_v32 = vpop.eup %698  ;;  %v363_v33 = vadd.f32 1e-06, %v1172_v30  ;;  %359 = vst [vmem:[%s1166_s25 + $0x10] sm:$0xff] %v1172_v30 }
 0x1b8   : > { %702 = vrcp.f32 %v362_v31  ;;  %v1180_v34 = vmul.f32 %v699_v32, %v691_v19 }
 0x1b9   : > { %704 = vrcp.f32 %v363_v33 }
 0x1ba   : > { %v364_v35 = vadd.f32 1e-06, %v1180_v34  ;;  %360 = vst [vmem:[%s1166_s25 + $0x18] sm:$0xff] %v1180_v34 }
 0x1bc   : > { %706 = vrcp.f32 %v364_v35 }
 0x1be   : > { %v701_v37 = vpop.eup %700 }
 0x1bf   : > { %v369_v38 = vmul.f32 %v701_v37, %v313_v36 }
 0x1c1   : > { %v373_v40 = vmul.f32 %v369_v38, %v1162_v25 }
 0x1c2   : > { %v703_v42 = vpop.eup %702 }
 0x1c3   : > { %v705_v43 = vpop.eup %704  ;;  %377 = vadd.xlane.f32.xlu0 %v373_v40  ;;  %v1189_v44 = vmul.f32 %v703_v42, %v314_v39 }
 0x1c4   : > { %v1191_v45 = vmul.f32 %v705_v43, %v315_v41 }
 0x1c5   : > { %v374_v47 = vmul.f32 %v1189_v44, %v1170_v29 }
 0x1c6   : > { %v707_v48 = vpop.eup %706  ;;  %v375_v49 = vmul.f32 %v1191_v45, %v1172_v30 }
 0x1c7   : > { %379 = vadd.xlane.f32.xlu1 %v374_v47  ;;  %v1198_v50 = vmul.f32 %v707_v48, %v316_v46 }
 0x1c8   : > { %381 = vadd.xlane.f32.xlu0 %v375_v49 }
 0x1c9   : > { %v376_v51 = vmul.f32 %v1198_v50, %v1180_v34 }
 0x1cb   : > { %383 = vadd.xlane.f32.xlu1 %v376_v51 }
 0x1cc   : > { %811 = shalt.err (!%p808_p9)
}
 0x1cd   : > { %s812_s8 = scalar_lea.hbm %s1208_s6, 512  ;;  %s816_s12 = scalar_lea.hbm %s1309_s3, 4096 }
 0x1ce   : > { %p813_p11 = scmp.ne.s32.totalorder %s1208_s6, %s812_s8  ;;  %p817_p4 = scmp.lt.u32.totalorder %s1208_s6, %s1309_s3 }
 0x1cf   : > { %p818_p1 = scmp.lt.u32.totalorder %s816_s12, %s812_s8  ;;  %p820_p12 = scmp.lt.u32.totalorder %s812_s8, %s1208_s6 }
 0x1d0   : > { %p814_p7 = pnand %p813_p11, %p1332_p5 }
 0x1d1   : > { %p819_p0 = por %p818_p1, %p817_p4 }
 0x1d2   : > { %p815_p2 = pneg %p814_p7 }
 0x1d3   : > { %p821_p6 = por %p820_p12, %p819_p0 }
 0x1d5   : > { %p822_p10 = pnand %p821_p6, %p815_p2 }
 0x1d7   : > { %825 = shalt.err (!%p822_p10)
}
 0x1d8   : > { %s908_s25 = smov 128   ;;  %s909_s20 = smov 8  }
 0x1d9   : > { %625 = dma.vmem_to_hbm [thread:$0]  (%p1332_p5), %s1211_s22, 512, %s1208_s6, %s406_s9, %s908_s25, %s908_s25, %s909_s20  }
 0x1da   : > { %s264_s7 = scalar_lea.vmem [#allocation7], %s1130_s28  ;;  %s303_s6 = scalar_lea.vmem [#allocation9], %s1130_s28 }
 0x1db   : > { %v317_v52 = vld [vmem:[%s264_s7] sm:$0xff]  ;;  %v318_v56 = vld [vmem:[%s264_s7 + $0x8] sm:$0xff]  ;;  %v319_v57 = vld [vmem:[%s264_s7 + $0x10] sm:$0xff]  ;;  %s440_s22 = sshll.u32 %s303_s6, 4  ;;  %s1260_s29 = scalar_lea.hbm %s1310_s4, %s617_s23  ;;  %s1253_s22 = int_to_ptr.vmem [resolvable:$true] %s440_s22 }
 0x1dc   : > { %v393_v54 = vsub.f32 %v1146_v0, %v317_v52  ;;  %v394_v60 = vsub.f32 %v1152_v2, %v318_v56  ;;  %v395_v4 = vsub.f32 %v1148_v1, %v319_v57  ;;  %v320_v5 = vld [vmem:[%s264_s7 + $0x18] sm:$0xff]  ;;  %s411_s30 = scalar_lea.sflag [#allocation10], %s1127_s14  ;;  %s826_s0 = scalar_lea.vmem %s1253_s22, 512 }
 0x1dd   : > { %v396_v2 = vsub.f32 %v1154_v3, %v320_v5  ;;  %p827_p13 = scmp.ne.s32.totalorder %s1253_s22, %s826_s0  ;;  %s910_s11 = smov [#allocation9]  }
 0x1de   : > { %s830_s8 = sshll.u32 %s910_s11, 4  ;;  %s831_s8 = int_to_ptr.vmem [resolvable:$false] %s830_s8 }
 0x1df   : > { %p828_p3 = pnand %p827_p13, %p1332_p5  ;;  %s832_s5 = scalar_lea.vmem %s831_s8, 1024 }
 0x1e0   : > { %p833_p9 = scmp.lt.s32.totalorder %s1253_s22, %s831_s8  ;;  %p834_p11 = scmp.lt.s32.totalorder %s832_s5, %s826_s0 }
 0x1e1   : > { %p829_p8 = pneg %p828_p3 }
 0x1e2   : > { %p835_p7 = por %p834_p11, %p833_p9 }
 0x1e4   : > { %p836_p2 = pnand %p835_p7, %p829_p8 }
 0x250   : > { %v378_v53 = vpop.xlane.xlu0 %377 }
 0x251   : > { %v385_v55 = vsub.f32 %v369_v38, %v378_v53 }
 0x253   : > { %v389_v58 = vmul.f32 %v385_v55, %v1162_v25 }
 0x254   : > { %v380_v59 = vpop.xlane.xlu1 %379 }
 0x255   : > { %v397_v61 = vmul.f32 %v393_v54, %v389_v58  ;;  %v386_v62 = vsub.f32 %v1189_v44, %v380_v59  ;;  %v382_v63 = vpop.xlane.xlu0 %381 }
 0x256   : > { %v387_v6 = vsub.f32 %v1191_v45, %v382_v63 }
 0x257   : > { %401 = vst [vmem:[%s303_s6] sm:$0xff] %v397_v61  ;;  %v390_v0 = vmul.f32 %v386_v62, %v1170_v29 }
 0x258   : > { %v391_v7 = vmul.f32 %v387_v6, %v1172_v30  ;;  %v384_v8 = vpop.xlane.xlu1 %383 }
 0x259   : > { %v398_v9 = vmul.f32 %v394_v60, %v390_v0  ;;  %v388_v10 = vsub.f32 %v1198_v50, %v384_v8 }
 0x25a   : > { %v399_v1 = vmul.f32 %v395_v4, %v391_v7 }
 0x25b   : > { %402 = vst [vmem:[%s303_s6 + $0x8] sm:$0xff] %v398_v9  ;;  %v392_v11 = vmul.f32 %v388_v10, %v1180_v34 }
 0x25c   : > { %403 = vst [vmem:[%s303_s6 + $0x10] sm:$0xff] %v399_v1 }
 0x25d   : > { %v400_v12 = vmul.f32 %v396_v2, %v392_v11 }
 0x25f   : > { %404 = vst [vmem:[%s303_s6 + $0x18] sm:$0xff] %v400_v12 }
 0x260   : > { %839 = shalt.err (!%p836_p2)
}
 0x261   : > { %s840_s19 = scalar_lea.hbm %s1260_s29, 512  ;;  %s844_s12 = scalar_lea.hbm %s1310_s4, 4096 }
 0x262   : > { %p841_p4 = scmp.ne.s32.totalorder %s1260_s29, %s840_s19  ;;  %p845_p12 = scmp.lt.u32.totalorder %s1260_s29, %s1310_s4 }
 0x263   : > { %p846_p6 = scmp.lt.u32.totalorder %s844_s12, %s840_s19  ;;  %p848_p13 = scmp.lt.u32.totalorder %s840_s19, %s1260_s29 }
 0x264   : > { %p842_p1 = pnand %p841_p4, %p1332_p5 }
 0x265   : > { %p847_p10 = por %p846_p6, %p845_p12 }
 0x266   : > { %p843_p0 = pneg %p842_p1 }
 0x267   : > { %p849_p3 = por %p848_p13, %p847_p10 }
 0x269   : > { %p850_p8 = pnand %p849_p3, %p843_p0 }
 0x26b   : > { %853 = shalt.err (!%p850_p8)
}
 0x26c   : > { %626 = dma.vmem_to_hbm [thread:$0]  (%p1332_p5), %s1253_s22, 512, %s1260_s29, %s411_s30, %s908_s25, %s908_s25, %s909_s20  }
 0x26d PF: > { %p647_p9 = scmp.ge.s32.totalorder %s900_s18, 2  ;;  %s455_s7 = sand.u32 1, %s888_s15  }
 0x26e   : > { %p1333_p11 = scmp.ne.s32.totalorder %s1321_s27, 0  ;;  %s456_s6 = scalar_lea.sflag [#allocation4], %s455_s7 }
 0x270   : > { %p640_p7 = pnand %p647_p9, %p1333_p11 }
 0x272   : > { %879 = dma.done.wait (!%p640_p7), %s456_s6, 512  }
 0x273   : > { %881 = vsyncadd (!%p640_p7), %s456_s6, 4294966784  ;;  %s465_s26 = scalar_lea.sflag [#allocation10], %s455_s7 }
 0x274   : > { %883 = dma.done.wait (!%p640_p7), %s465_s26, 512  }
 0x275   : > { %885 = vsyncadd (!%p640_p7), %s465_s26, 4294966784  ;;  %p24_p5 = scmp.ge.s32.totalorder %s961_s21, 10   ;;  %s1334_s15 = smov %s892_s16 }
 0x276   : > { %s1335_s16 = smov %s896_s17  ;;  %s1336_s17 = smov %s973_s24 }
 0x277   : > { %s1337_s18 = smov %s961_s21  ;;  %26 = sbr.rel (!%p24_p5) target bundleno = 12 (0xc), region = 118 }
 0x27e   :  { %470 = vsyncpa [#allocation3], 1 }
 0x27f   :  { %472 = vsyncpa [#allocation3 + $0x1], 1 }
 0x280   :  { %473 = vsyncpa [#allocation6], 1 }
 0x281   :  { %475 = vsyncpa [#allocation6 + $0x1], 1 }
 0x282   :  { %476 = vsyncpa [#allocation4], 1 }
 0x283   :  { %478 = vsyncpa [#allocation4 + $0x1], 1 }
 0x284   :  { %479 = vsyncpa [#allocation10], 1 }
 0x285   :  { %481 = vsyncpa [#allocation10 + $0x1], 1 }

</bundles_post_ra>
